<compile_context>
chip_gen: v5e
topology: v5e:2x2
jax: 0.10.0
libtpu: 0.0.40
codegen_flags: <defaults>
</compile_context>

<pallas_src>
import functools

import numpy as np
import jax
import jax.numpy as jnp
from jax import lax
from jax.experimental import pallas as pl
from jax.experimental.pallas import tpu as pltpu


def _flowhead_kernel(x_ref, w1_ref, b1_ref, w2_ref, b2_ref, rowcol_ref, out_ref,
                     *, height, width, rows_per_strip, compute_dtype):
    """One (batch, row-strip) step of conv3x3 -> ReLU -> conv3x3 (SAME).

    x_ref      : (Cin, D)        f32   strip rows [s*R-2, s*R+R+2) of x,
                                       zero-extended outside the image,
                                       flattened row-major, lane-padded to D.
    w1_ref     : (9, Chid, Cin)  bf16  conv1 weights, tap-major.
    b1_ref     : (Chid, 1)       f32
    w2_ref     : (9*Cout, Chid)  bf16  conv2 weights, tap-major rows.
    b2_ref     : (Cout, 1)       f32
    rowcol_ref : (2, D)          int32 strip-local (row, col) of every lane.
    out_ref    : (Cout, R*W)           output rows [s*R, s*R+R) of this strip.
    """
    r = rows_per_strip
    cout = out_ref.shape[0]
    d = x_ref.shape[-1]
    assert d >= (r + 4) * width  # trace-time sanity

    x = x_ref[...]                                         # (Cin, D) f32
    rowv = rowcol_ref[0:1, :]                              # (1, D) strip-local row
    colv = rowcol_ref[1:2, :]                              # (1, D) column

    # Column-validity masks, built in-kernel (VPU compares).  Only taps with
    # dx != 0 need one; vertical taps are correct by construction (zero halo
    # rows in the strip + the final row slice).
    def col_masks(dtype):
        return {
            -1: jnp.where(colv >= 1, 1.0, 0.0).astype(dtype),          # reads x-1
            0: None,
            1: jnp.where(colv <= width - 2, 1.0, 0.0).astype(dtype),   # reads x+1
        }
    cmask_cd = col_masks(compute_dtype)    # for conv1 taps
    cmask_f32 = col_masks(jnp.float32)     # for conv2 partials

    def tap_read(a, dy, dx):
        """a[:, p] -> a[:, p + dy*W + dx] via one static XLU lane rotation."""
        off = dy * width + dx
        return a if off == 0 else pltpu.roll(a, shift=(-off) % d, axis=1)

    # ---- conv1: nine per-tap (Chid, Cin) x (Cin, D) MXU matmuls, f32 acc ----
    acc = None
    for t in range(9):
        dy, dx = t // 3 - 1, t % 3 - 1
        tap = tap_read(x, dy, dx).astype(compute_dtype)
        if cmask_cd[dx] is not None:
            tap = tap * cmask_cd[dx]
        part = jnp.dot(w1_ref[t], tap, preferred_element_type=jnp.float32)
        acc = part if acc is None else acc + part          # (Chid, D) f32

    h = jnp.maximum(acc + b1_ref[...], 0.0)                # bias + ReLU, f32

    # Zero h rows whose *global* image row lies outside [0, H): conv2 must see
    # SAME-padding zeros there (only bites on the first / last strip).
    g_row = rowv + (pl.program_id(1) * r - 2)
    h = h * jnp.where((g_row >= 0) & (g_row <= height - 1), 1.0, 0.0)
    h = h.astype(compute_dtype)

    # ---- conv2: output-side tap decomposition -------------------------------
    # ONE (9*Cout, Chid) x (Chid, D) matmul (K = Chid, one K pass), then nine
    # small (Cout, D) partials are rolled, column-masked and summed.
    p_all = jnp.dot(w2_ref[...], h, preferred_element_type=jnp.float32)
    o = None
    for t in range(9):
        dy, dx = t // 3 - 1, t % 3 - 1
        part = tap_read(p_all[t * cout:(t + 1) * cout, :], dy, dx)
        if cmask_f32[dx] is not None:
            part = part * cmask_f32[dx]
        o = part if o is None else o + part                # (Cout, D) f32

    # Drop the 2-row halo on each side -> the R real output rows of the strip.
    o = o[:, 2 * width:(2 + r) * width]
    out_ref[...] = (o + b2_ref[...]).astype(out_ref.dtype)


def _pick_rows_per_strip(height, width, cin, chid, cout, vmem_budget_bytes, n_batch):
    """Largest divisor-of-H strip whose per-step live set fits the VMEM budget,
    keeping the strip's output lane count a multiple of 128 (lane-dense stores)
    and, when possible, at least two grid steps (megacore occupancy)."""
    def strip_bytes(r):
        d = ((r + 4) * width + 127) // 128 * 128
        per_lane = (cin * 4 * 2            # f32 x strip (double-buffered input block)
                    + cin * (4 + 2)        # rolled f32 tap + bf16 tap
                    + chid * (4 + 2)       # f32 conv1 accumulator + bf16 h
                    + 9 * cout * 4         # conv2 tap-partial matmul result
                    + cout * 4 * 3)        # conv2 accumulator + output blocks
        return d * per_lane
    divisors = [r for r in range(1, height + 1) if height % r == 0]
    aligned = [r for r in divisors if (r * width) % 128 == 0 or r == height]
    fitting = [r for r in aligned if strip_bytes(r) <= vmem_budget_bytes]
    if not fitting:
        return min(aligned)                # smallest legal strip
    multi = [r for r in fitting if n_batch * (height // r) >= 2]
    return max(multi) if multi else max(fitting)


def flow_head_pallas(x_nchw, w1, b1, w2, b2, *, rows_per_strip=None,
                     compute_dtype=jnp.bfloat16):
    """FlowHead.forward: conv2(relu(conv1(x))), both 3x3 / SAME.

    x_nchw : (N, Cin, H, W) f32 (PyTorch layout);  w1: (Chid, Cin, 3, 3),
    b1: (Chid,), w2: (Cout, Chid, 3, 3), b2: (Cout,).  Returns (N, Cout, H, W)
    f32 (bf16 MXU inputs, f32 accumulation)."""
    n, cin, height, width = x_nchw.shape
    chid, cout = w1.shape[0], w2.shape[0]
    assert height >= 1 and width >= 1

    # Per-generation VMEM budget (v5e/v6e: 128 MiB, v7x: 64 MiB physical).
    try:
        vmem_cap = int(pltpu.get_tpu_info().vmem_capacity_bytes)
    except Exception:
        vmem_cap = 64 * 1024 * 1024
    vmem_limit = (vmem_cap * 3) // 4

    if rows_per_strip is None:
        rows_per_strip = _pick_rows_per_strip(height, width, cin, chid, cout,
                                              vmem_limit, n)
    r = int(rows_per_strip)
    assert height % r == 0, "rows_per_strip must divide H"
    n_strips = height // r
    if n_strips > 1:
        assert (r * width) % 128 == 0, (
            "rows_per_strip * W must be a multiple of 128 when using more "
            "than one strip (lane-dense output blocks)")

    # Strip domain: R output rows + 2 halo rows on each side, flattened
    # row-major and zero-padded to a multiple of 128 lanes.
    d_real = (r + 4) * width
    d = ((d_real + 127) // 128) * 128

    # Halo'd strips (N, S, Cin, D), built once from a 2-row zero-padded copy of
    # x (one cheap extra HBM pass over x vs. the O(9*Cin*Chid*HW) conv FLOPs).
    x_pad = jnp.pad(x_nchw, ((0, 0), (0, 0), (2, 2), (0, 0)))
    strips = [lax.slice_in_dim(x_pad, s * r, s * r + r + 4, axis=2)
              for s in range(n_strips)]
    x_strips = jnp.stack(strips, axis=1).reshape(n, n_strips, cin, d_real)
    if d != d_real:
        x_strips = jnp.pad(x_strips, ((0, 0), (0, 0), (0, 0), (0, d - d_real)))

    # PyTorch (O, I, kh, kw) -> tap-major weights, pre-cast to the MXU dtype.
    w1t = jnp.transpose(w1, (2, 3, 0, 1)).reshape(9, chid, cin).astype(compute_dtype)
    w2t = jnp.transpose(w2, (2, 3, 0, 1)).reshape(9 * cout, chid).astype(compute_dtype)
    b1r = b1.reshape(chid, 1).astype(jnp.float32)
    b2r = b2.reshape(cout, 1).astype(jnp.float32)

    # Strip-local (row, col) index of every lane; in-kernel compares on this
    # tiny resident operand replace the old (9, H*W) f32 mask input.
    rows = np.repeat(np.arange(r + 4, dtype=np.int32), width)
    cols = np.tile(np.arange(width, dtype=np.int32), r + 4)
    pad_n = d - d_real
    rows = np.concatenate([rows, np.full((pad_n,), -(height + 8), np.int32)])
    cols = np.concatenate([cols, np.full((pad_n,), -8, np.int32)])
    rowcol = jnp.asarray(np.stack([rows, cols], axis=0))            # (2, D)

    kernel = functools.partial(_flowhead_kernel, height=height, width=width,
                               rows_per_strip=r, compute_dtype=compute_dtype)

    out2d = pl.pallas_call(
        kernel,
        out_shape=jax.ShapeDtypeStruct((n, cout, height * width), x_nchw.dtype),
        grid_spec=pltpu.PrefetchScalarGridSpec(
            num_scalar_prefetch=0,
            grid=(n, n_strips),                      # batch x row-strips
            in_specs=[
                pl.BlockSpec((None, None, cin, d), lambda b, s: (b, s, 0, 0)),
                pl.BlockSpec((9, chid, cin), lambda b, s: (0, 0, 0)),
                pl.BlockSpec((chid, 1), lambda b, s: (0, 0)),
                pl.BlockSpec((9 * cout, chid), lambda b, s: (0, 0)),
                pl.BlockSpec((cout, 1), lambda b, s: (0, 0)),
                pl.BlockSpec((2, d), lambda b, s: (0, 0)),
            ],
            out_specs=pl.BlockSpec((None, cout, r * width), lambda b, s: (b, 0, s)),
        ),
        compiler_params=pltpu.CompilerParams(
            dimension_semantics=("parallel", "parallel"),
            vmem_limit_bytes=vmem_limit),
    )(x_strips, w1t, b1r, w2t, b2r, rowcol)

    # Free reshape back to NCHW -- the kernel already emits channel-first.
    return out2d.reshape(n, cout, height, width)


def _reference_flow_head(x, w1, b1, w2, b2, compute_dtype=jnp.bfloat16):
    """Pure-JAX reference with operands rounded to the kernel's MXU input dtype
    (products exact, f32 accumulation) so it matches the kernel's numerics."""
    rt = lambda a: a.astype(compute_dtype).astype(jnp.float32)
    dn = ("NCHW", "OIHW", "NCHW")
    y = lax.conv_general_dilated(rt(x), rt(w1), (1, 1), "SAME",
                                 dimension_numbers=dn,
                                 precision=lax.Precision.HIGHEST)
    y = jnp.maximum(y + b1[None, :, None, None], 0.0)
    z = lax.conv_general_dilated(rt(y), rt(w2), (1, 1), "SAME",
                                 dimension_numbers=dn,
                                 precision=lax.Precision.HIGHEST)
    return z + b2[None, :, None, None]


if __name__ == "__main__":
    key = jax.random.PRNGKey(0)
    ks = jax.random.split(key, 10)

    def run_case(kx, kw1, kb1, kw2, kb2, *, n, cin, chid, cout, h, w, rows_per_strip):
        x = jax.random.normal(kx, (n, cin, h, w), dtype=jnp.float32)
        w1 = jax.random.normal(kw1, (chid, cin, 3, 3), dtype=jnp.float32) * 0.1
        b1 = jax.random.normal(kb1, (chid,), dtype=jnp.float32) * 0.1
        w2 = jax.random.normal(kw2, (cout, chid, 3, 3), dtype=jnp.float32) * 0.1
        b2 = jax.random.normal(kb2, (cout,), dtype=jnp.float32) * 0.1
        out = jax.block_until_ready(
            flow_head_pallas(x, w1, b1, w2, b2, rows_per_strip=rows_per_strip))
        ref = jax.block_until_ready(_reference_flow_head(x, w1, b1, w2, b2))
        assert out.shape == (n, cout, h, w), out.shape
        err = float(jnp.max(jnp.abs(out - ref)))
        assert jnp.allclose(out, ref, atol=2e-2, rtol=2e-2), err

    # Multi-strip path: 2 row strips of 8 rows (strip output lanes = 128),
    # lane-padded strip domain (192 -> 256 lanes).
    run_case(*ks[0:5], n=2, cin=8, chid=16, cout=2, h=16, w=16, rows_per_strip=8)
    # Single-strip path + automatic strip selection (exercises the picker).
    run_case(*ks[5:10], n=1, cin=4, chid=8, cout=2, h=12, w=8, rows_per_strip=None)

    print("KERNEL_OK")
</pallas_src>

<mosaic_0001>
module attributes {stable_mosaic.version = 11 : i64} {
  func.func @_flowhead_kernel(%arg0: i32, %arg1: i32, %arg2: memref<1x1x8x256xf32, #tpu.memory_space<vmem>>, %arg3: memref<9x16x8xbf16, #tpu.memory_space<vmem>>, %arg4: memref<16x1xf32, #tpu.memory_space<vmem>>, %arg5: memref<18x16xbf16, #tpu.memory_space<vmem>>, %arg6: memref<2x1xf32, #tpu.memory_space<vmem>>, %arg7: memref<2x256xi32, #tpu.memory_space<vmem>>, %arg8: memref<1x2x128xf32, #tpu.memory_space<vmem>>) attributes {dimension_semantics = [#tpu.dimension_semantics<parallel>, #tpu.dimension_semantics<parallel>], iteration_bounds = array<i64: 2, 2>, scalar_prefetch = 0 : i64, scratch_operands = 0 : i64, tpu.core_type = #tpu.core_type<tc>, window_params = [{transform_indices = @transform_0, window_bounds = array<i64: 1, 1, 8, 256>}, {pipeline_mode = #tpu.pipeline_mode<synchronous>, transform_indices = @transform_1, window_bounds = array<i64: 9, 16, 8>}, {pipeline_mode = #tpu.pipeline_mode<synchronous>, transform_indices = @transform_2, window_bounds = array<i64: 16, 1>}, {pipeline_mode = #tpu.pipeline_mode<synchronous>, transform_indices = @transform_3, window_bounds = array<i64: 18, 16>}, {pipeline_mode = #tpu.pipeline_mode<synchronous>, transform_indices = @transform_4, window_bounds = array<i64: 2, 1>}, {pipeline_mode = #tpu.pipeline_mode<synchronous>, transform_indices = @transform_5, window_bounds = array<i64: 2, 256>}, {transform_indices = @transform_6, window_bounds = array<i64: 1, 2, 128>}]} {
    %c0 = arith.constant 0 : index
    %c0_0 = arith.constant 0 : index
    %c0_1 = arith.constant 0 : index
    %c0_2 = arith.constant 0 : index
    %0 = vector.load %arg2[%c0, %c0_0, %c0_1, %c0_2] : memref<1x1x8x256xf32, #tpu.memory_space<vmem>>, vector<1x1x8x256xf32>
    %1 = vector.shape_cast %0 : vector<1x1x8x256xf32> to vector<8x256xf32>
    %c0_3 = arith.constant 0 : index
    %c0_4 = arith.constant 0 : index
    %2 = vector.load %arg7[%c0_3, %c0_4] : memref<2x256xi32, #tpu.memory_space<vmem>>, vector<1x256xi32>
    %c1 = arith.constant 1 : index
    %c0_5 = arith.constant 0 : index
    %3 = vector.load %arg7[%c1, %c0_5] : memref<2x256xi32, #tpu.memory_space<vmem>>, vector<1x256xi32>
    %c1_i32 = arith.constant 1 : i32
    %4 = vector.broadcast %c1_i32 : i32 to vector<1x256xi32>
    %5 = arith.cmpi sge, %3, %4 : vector<1x256xi32>
    %cst = arith.constant 1.000000e+00 : f32
    %cst_6 = arith.constant 0.000000e+00 : f32
    %6 = vector.broadcast %cst : f32 to vector<1x256xf32>
    %7 = vector.broadcast %cst_6 : f32 to vector<1x256xf32>
    %8 = arith.select %5, %6, %7 : vector<1x256xi1>, vector<1x256xf32>
    %9 = arith.truncf %8 : vector<1x256xf32> to vector<1x256xbf16>
    %c14_i32 = arith.constant 14 : i32
    %10 = vector.broadcast %c14_i32 : i32 to vector<1x256xi32>
    %11 = arith.cmpi sle, %3, %10 : vector<1x256xi32>
    %cst_7 = arith.constant 1.000000e+00 : f32
    %cst_8 = arith.constant 0.000000e+00 : f32
    %12 = vector.broadcast %cst_7 : f32 to vector<1x256xf32>
    %13 = vector.broadcast %cst_8 : f32 to vector<1x256xf32>
    %14 = arith.select %11, %12, %13 : vector<1x256xi1>, vector<1x256xf32>
    %15 = arith.truncf %14 : vector<1x256xf32> to vector<1x256xbf16>
    %c1_i32_9 = arith.constant 1 : i32
    %16 = vector.broadcast %c1_i32_9 : i32 to vector<1x256xi32>
    %17 = arith.cmpi sge, %3, %16 : vector<1x256xi32>
    %cst_10 = arith.constant 1.000000e+00 : f32
    %cst_11 = arith.constant 0.000000e+00 : f32
    %18 = vector.broadcast %cst_10 : f32 to vector<1x256xf32>
    %19 = vector.broadcast %cst_11 : f32 to vector<1x256xf32>
    %20 = arith.select %17, %18, %19 : vector<1x256xi1>, vector<1x256xf32>
    %c14_i32_12 = arith.constant 14 : i32
    %21 = vector.broadcast %c14_i32_12 : i32 to vector<1x256xi32>
    %22 = arith.cmpi sle, %3, %21 : vector<1x256xi32>
    %cst_13 = arith.constant 1.000000e+00 : f32
    %cst_14 = arith.constant 0.000000e+00 : f32
    %23 = vector.broadcast %cst_13 : f32 to vector<1x256xf32>
    %24 = vector.broadcast %cst_14 : f32 to vector<1x256xf32>
    %25 = arith.select %22, %23, %24 : vector<1x256xi1>, vector<1x256xf32>
    %c17_i32 = arith.constant 17 : i32
    %26 = tpu.dynamic_rotate %1 by %c17_i32 dim 1 : vector<8x256xf32>, i32 -> vector<8x256xf32>
    %27 = arith.truncf %26 : vector<8x256xf32> to vector<8x256xbf16>
    %28 = vector.broadcast %9 : vector<1x256xbf16> to vector<8x256xbf16>
    %29 = arith.mulf %27, %28 : vector<8x256xbf16>
    %c0_15 = arith.constant 0 : index
    %c0_16 = arith.constant 0 : index
    %c0_17 = arith.constant 0 : index
    %30 = vector.load %arg3[%c0_15, %c0_16, %c0_17] : memref<9x16x8xbf16, #tpu.memory_space<vmem>>, vector<1x16x8xbf16>
    %31 = vector.shape_cast %30 : vector<1x16x8xbf16> to vector<16x8xbf16>
    %cst_18 = arith.constant dense<0.000000e+00> : vector<16x256xf32>
    %32 = tpu.matmul %31, %29, %cst_18 {dimension_numbers = #tpu.dot_dimension_numbers<[1], [0], [0], [1], [0, 0, 1, 1], [], []>} : vector<16x8xbf16>, vector<8x256xbf16>, vector<16x256xf32> -> vector<16x256xf32>
    %c16_i32 = arith.constant 16 : i32
    %33 = tpu.dynamic_rotate %1 by %c16_i32 dim 1 : vector<8x256xf32>, i32 -> vector<8x256xf32>
    %34 = arith.truncf %33 : vector<8x256xf32> to vector<8x256xbf16>
    %c1_19 = arith.constant 1 : index
    %c0_20 = arith.constant 0 : index
    %c0_21 = arith.constant 0 : index
    %35 = vector.load %arg3[%c1_19, %c0_20, %c0_21] : memref<9x16x8xbf16, #tpu.memory_space<vmem>>, vector<1x16x8xbf16>
    %36 = vector.shape_cast %35 : vector<1x16x8xbf16> to vector<16x8xbf16>
    %cst_22 = arith.constant dense<0.000000e+00> : vector<16x256xf32>
    %37 = tpu.matmul %36, %34, %cst_22 {dimension_numbers = #tpu.dot_dimension_numbers<[1], [0], [0], [1], [0, 0, 1, 1], [], []>} : vector<16x8xbf16>, vector<8x256xbf16>, vector<16x256xf32> -> vector<16x256xf32>
    %38 = arith.addf %32, %37 : vector<16x256xf32>
    %c15_i32 = arith.constant 15 : i32
    %39 = tpu.dynamic_rotate %1 by %c15_i32 dim 1 : vector<8x256xf32>, i32 -> vector<8x256xf32>
    %40 = arith.truncf %39 : vector<8x256xf32> to vector<8x256xbf16>
    %41 = vector.broadcast %15 : vector<1x256xbf16> to vector<8x256xbf16>
    %42 = arith.mulf %40, %41 : vector<8x256xbf16>
    %c2 = arith.constant 2 : index
    %c0_23 = arith.constant 0 : index
    %c0_24 = arith.constant 0 : index
    %43 = vector.load %arg3[%c2, %c0_23, %c0_24] : memref<9x16x8xbf16, #tpu.memory_space<vmem>>, vector<1x16x8xbf16>
    %44 = vector.shape_cast %43 : vector<1x16x8xbf16> to vector<16x8xbf16>
    %cst_25 = arith.constant dense<0.000000e+00> : vector<16x256xf32>
    %45 = tpu.matmul %44, %42, %cst_25 {dimension_numbers = #tpu.dot_dimension_numbers<[1], [0], [0], [1], [0, 0, 1, 1], [], []>} : vector<16x8xbf16>, vector<8x256xbf16>, vector<16x256xf32> -> vector<16x256xf32>
    %46 = arith.addf %38, %45 : vector<16x256xf32>
    %c1_i32_26 = arith.constant 1 : i32
    %47 = tpu.dynamic_rotate %1 by %c1_i32_26 dim 1 : vector<8x256xf32>, i32 -> vector<8x256xf32>
    %48 = arith.truncf %47 : vector<8x256xf32> to vector<8x256xbf16>
    %49 = vector.broadcast %9 : vector<1x256xbf16> to vector<8x256xbf16>
    %50 = arith.mulf %48, %49 : vector<8x256xbf16>
    %c3 = arith.constant 3 : index
    %c0_27 = arith.constant 0 : index
    %c0_28 = arith.constant 0 : index
    %51 = vector.load %arg3[%c3, %c0_27, %c0_28] : memref<9x16x8xbf16, #tpu.memory_space<vmem>>, vector<1x16x8xbf16>
    %52 = vector.shape_cast %51 : vector<1x16x8xbf16> to vector<16x8xbf16>
    %cst_29 = arith.constant dense<0.000000e+00> : vector<16x256xf32>
    %53 = tpu.matmul %52, %50, %cst_29 {dimension_numbers = #tpu.dot_dimension_numbers<[1], [0], [0], [1], [0, 0, 1, 1], [], []>} : vector<16x8xbf16>, vector<8x256xbf16>, vector<16x256xf32> -> vector<16x256xf32>
    %54 = arith.addf %46, %53 : vector<16x256xf32>
    %55 = arith.truncf %1 : vector<8x256xf32> to vector<8x256xbf16>
    %c4 = arith.constant 4 : index
    %c0_30 = arith.constant 0 : index
    %c0_31 = arith.constant 0 : index
    %56 = vector.load %arg3[%c4, %c0_30, %c0_31] : memref<9x16x8xbf16, #tpu.memory_space<vmem>>, vector<1x16x8xbf16>
    %57 = vector.shape_cast %56 : vector<1x16x8xbf16> to vector<16x8xbf16>
    %cst_32 = arith.constant dense<0.000000e+00> : vector<16x256xf32>
    %58 = tpu.matmul %57, %55, %cst_32 {dimension_numbers = #tpu.dot_dimension_numbers<[1], [0], [0], [1], [0, 0, 1, 1], [], []>} : vector<16x8xbf16>, vector<8x256xbf16>, vector<16x256xf32> -> vector<16x256xf32>
    %59 = arith.addf %54, %58 : vector<16x256xf32>
    %c255_i32 = arith.constant 255 : i32
    %60 = tpu.dynamic_rotate %1 by %c255_i32 dim 1 : vector<8x256xf32>, i32 -> vector<8x256xf32>
    %61 = arith.truncf %60 : vector<8x256xf32> to vector<8x256xbf16>
    %62 = vector.broadcast %15 : vector<1x256xbf16> to vector<8x256xbf16>
    %63 = arith.mulf %61, %62 : vector<8x256xbf16>
    %c5 = arith.constant 5 : index
    %c0_33 = arith.constant 0 : index
    %c0_34 = arith.constant 0 : index
    %64 = vector.load %arg3[%c5, %c0_33, %c0_34] : memref<9x16x8xbf16, #tpu.memory_space<vmem>>, vector<1x16x8xbf16>
    %65 = vector.shape_cast %64 : vector<1x16x8xbf16> to vector<16x8xbf16>
    %cst_35 = arith.constant dense<0.000000e+00> : vector<16x256xf32>
    %66 = tpu.matmul %65, %63, %cst_35 {dimension_numbers = #tpu.dot_dimension_numbers<[1], [0], [0], [1], [0, 0, 1, 1], [], []>} : vector<16x8xbf16>, vector<8x256xbf16>, vector<16x256xf32> -> vector<16x256xf32>
    %67 = arith.addf %59, %66 : vector<16x256xf32>
    %c241_i32 = arith.constant 241 : i32
    %68 = tpu.dynamic_rotate %1 by %c241_i32 dim 1 : vector<8x256xf32>, i32 -> vector<8x256xf32>
    %69 = arith.truncf %68 : vector<8x256xf32> to vector<8x256xbf16>
    %70 = vector.broadcast %9 : vector<1x256xbf16> to vector<8x256xbf16>
    %71 = arith.mulf %69, %70 : vector<8x256xbf16>
    %c6 = arith.constant 6 : index
    %c0_36 = arith.constant 0 : index
    %c0_37 = arith.constant 0 : index
    %72 = vector.load %arg3[%c6, %c0_36, %c0_37] : memref<9x16x8xbf16, #tpu.memory_space<vmem>>, vector<1x16x8xbf16>
    %73 = vector.shape_cast %72 : vector<1x16x8xbf16> to vector<16x8xbf16>
    %cst_38 = arith.constant dense<0.000000e+00> : vector<16x256xf32>
    %74 = tpu.matmul %73, %71, %cst_38 {dimension_numbers = #tpu.dot_dimension_numbers<[1], [0], [0], [1], [0, 0, 1, 1], [], []>} : vector<16x8xbf16>, vector<8x256xbf16>, vector<16x256xf32> -> vector<16x256xf32>
    %75 = arith.addf %67, %74 : vector<16x256xf32>
    %c240_i32 = arith.constant 240 : i32
    %76 = tpu.dynamic_rotate %1 by %c240_i32 dim 1 : vector<8x256xf32>, i32 -> vector<8x256xf32>
    %77 = arith.truncf %76 : vector<8x256xf32> to vector<8x256xbf16>
    %c7 = arith.constant 7 : index
    %c0_39 = arith.constant 0 : index
    %c0_40 = arith.constant 0 : index
    %78 = vector.load %arg3[%c7, %c0_39, %c0_40] : memref<9x16x8xbf16, #tpu.memory_space<vmem>>, vector<1x16x8xbf16>
    %79 = vector.shape_cast %78 : vector<1x16x8xbf16> to vector<16x8xbf16>
    %cst_41 = arith.constant dense<0.000000e+00> : vector<16x256xf32>
    %80 = tpu.matmul %79, %77, %cst_41 {dimension_numbers = #tpu.dot_dimension_numbers<[1], [0], [0], [1], [0, 0, 1, 1], [], []>} : vector<16x8xbf16>, vector<8x256xbf16>, vector<16x256xf32> -> vector<16x256xf32>
    %81 = arith.addf %75, %80 : vector<16x256xf32>
    %c239_i32 = arith.constant 239 : i32
    %82 = tpu.dynamic_rotate %1 by %c239_i32 dim 1 : vector<8x256xf32>, i32 -> vector<8x256xf32>
    %83 = arith.truncf %82 : vector<8x256xf32> to vector<8x256xbf16>
    %84 = vector.broadcast %15 : vector<1x256xbf16> to vector<8x256xbf16>
    %85 = arith.mulf %83, %84 : vector<8x256xbf16>
    %c8 = arith.constant 8 : index
    %c0_42 = arith.constant 0 : index
    %c0_43 = arith.constant 0 : index
    %86 = vector.load %arg3[%c8, %c0_42, %c0_43] : memref<9x16x8xbf16, #tpu.memory_space<vmem>>, vector<1x16x8xbf16>
    %87 = vector.shape_cast %86 : vector<1x16x8xbf16> to vector<16x8xbf16>
    %cst_44 = arith.constant dense<0.000000e+00> : vector<16x256xf32>
    %88 = tpu.matmul %87, %85, %cst_44 {dimension_numbers = #tpu.dot_dimension_numbers<[1], [0], [0], [1], [0, 0, 1, 1], [], []>} : vector<16x8xbf16>, vector<8x256xbf16>, vector<16x256xf32> -> vector<16x256xf32>
    %89 = arith.addf %81, %88 : vector<16x256xf32>
    %c0_45 = arith.constant 0 : index
    %c0_46 = arith.constant 0 : index
    %90 = vector.load %arg4[%c0_45, %c0_46] : memref<16x1xf32, #tpu.memory_space<vmem>>, vector<16x1xf32>
    %91 = vector.broadcast %90 : vector<16x1xf32> to vector<16x256xf32>
    %92 = arith.addf %89, %91 : vector<16x256xf32>
    %cst_47 = arith.constant 0.000000e+00 : f32
    %93 = vector.broadcast %cst_47 : f32 to vector<16x256xf32>
    %94 = arith.maximumf %92, %93 : vector<16x256xf32>
    %c8_i32 = arith.constant 8 : i32
    %95 = arith.muli %arg1, %c8_i32 : i32
    %c2_i32 = arith.constant 2 : i32
    %96 = arith.subi %95, %c2_i32 : i32
    %97 = vector.broadcast %96 : i32 to vector<1x256xi32>
    %98 = arith.addi %2, %97 : vector<1x256xi32>
    %c0_i32 = arith.constant 0 : i32
    %99 = vector.broadcast %c0_i32 : i32 to vector<1x256xi32>
    %100 = arith.cmpi sge, %98, %99 : vector<1x256xi32>
    %c15_i32_48 = arith.constant 15 : i32
    %101 = vector.broadcast %c15_i32_48 : i32 to vector<1x256xi32>
    %102 = arith.cmpi sle, %98, %101 : vector<1x256xi32>
    %103 = arith.andi %100, %102 : vector<1x256xi1>
    %cst_49 = arith.constant 1.000000e+00 : f32
    %cst_50 = arith.constant 0.000000e+00 : f32
    %104 = vector.broadcast %cst_49 : f32 to vector<1x256xf32>
    %105 = vector.broadcast %cst_50 : f32 to vector<1x256xf32>
    %106 = arith.select %103, %104, %105 : vector<1x256xi1>, vector<1x256xf32>
    %107 = vector.broadcast %106 : vector<1x256xf32> to vector<16x256xf32>
    %108 = arith.mulf %94, %107 : vector<16x256xf32>
    %109 = arith.truncf %108 : vector<16x256xf32> to vector<16x256xbf16>
    %c0_51 = arith.constant 0 : index
    %c0_52 = arith.constant 0 : index
    %110 = vector.load %arg5[%c0_51, %c0_52] : memref<18x16xbf16, #tpu.memory_space<vmem>>, vector<18x16xbf16>
    %cst_53 = arith.constant dense<0.000000e+00> : vector<18x256xf32>
    %111 = tpu.matmul %110, %109, %cst_53 {dimension_numbers = #tpu.dot_dimension_numbers<[1], [0], [0], [1], [0, 0, 1, 1], [], []>} : vector<18x16xbf16>, vector<16x256xbf16>, vector<18x256xf32> -> vector<18x256xf32>
    %112 = vector.extract_strided_slice %111 {offsets = [0, 0], sizes = [2, 256], strides = [1, 1]} : vector<18x256xf32> to vector<2x256xf32>
    %c17_i32_54 = arith.constant 17 : i32
    %113 = tpu.dynamic_rotate %112 by %c17_i32_54 dim 1 : vector<2x256xf32>, i32 -> vector<2x256xf32>
    %114 = vector.broadcast %20 : vector<1x256xf32> to vector<2x256xf32>
    %115 = arith.mulf %113, %114 : vector<2x256xf32>
    %116 = vector.extract_strided_slice %111 {offsets = [2, 0], sizes = [2, 256], strides = [1, 1]} : vector<18x256xf32> to vector<2x256xf32>
    %c16_i32_55 = arith.constant 16 : i32
    %117 = tpu.dynamic_rotate %116 by %c16_i32_55 dim 1 : vector<2x256xf32>, i32 -> vector<2x256xf32>
    %118 = arith.addf %115, %117 : vector<2x256xf32>
    %119 = vector.extract_strided_slice %111 {offsets = [4, 0], sizes = [2, 256], strides = [1, 1]} : vector<18x256xf32> to vector<2x256xf32>
    %c15_i32_56 = arith.constant 15 : i32
    %120 = tpu.dynamic_rotate %119 by %c15_i32_56 dim 1 : vector<2x256xf32>, i32 -> vector<2x256xf32>
    %121 = vector.broadcast %25 : vector<1x256xf32> to vector<2x256xf32>
    %122 = arith.mulf %120, %121 : vector<2x256xf32>
    %123 = arith.addf %118, %122 : vector<2x256xf32>
    %124 = vector.extract_strided_slice %111 {offsets = [6, 0], sizes = [2, 256], strides = [1, 1]} : vector<18x256xf32> to vector<2x256xf32>
    %c1_i32_57 = arith.constant 1 : i32
    %125 = tpu.dynamic_rotate %124 by %c1_i32_57 dim 1 : vector<2x256xf32>, i32 -> vector<2x256xf32>
    %126 = vector.broadcast %20 : vector<1x256xf32> to vector<2x256xf32>
    %127 = arith.mulf %125, %126 : vector<2x256xf32>
    %128 = arith.addf %123, %127 : vector<2x256xf32>
    %129 = vector.extract_strided_slice %111 {offsets = [8, 0], sizes = [2, 256], strides = [1, 1]} : vector<18x256xf32> to vector<2x256xf32>
    %130 = arith.addf %128, %129 : vector<2x256xf32>
    %131 = vector.extract_strided_slice %111 {offsets = [10, 0], sizes = [2, 256], strides = [1, 1]} : vector<18x256xf32> to vector<2x256xf32>
    %c255_i32_58 = arith.constant 255 : i32
    %132 = tpu.dynamic_rotate %131 by %c255_i32_58 dim 1 : vector<2x256xf32>, i32 -> vector<2x256xf32>
    %133 = vector.broadcast %25 : vector<1x256xf32> to vector<2x256xf32>
    %134 = arith.mulf %132, %133 : vector<2x256xf32>
    %135 = arith.addf %130, %134 : vector<2x256xf32>
    %136 = vector.extract_strided_slice %111 {offsets = [12, 0], sizes = [2, 256], strides = [1, 1]} : vector<18x256xf32> to vector<2x256xf32>
    %c241_i32_59 = arith.constant 241 : i32
    %137 = tpu.dynamic_rotate %136 by %c241_i32_59 dim 1 : vector<2x256xf32>, i32 -> vector<2x256xf32>
    %138 = vector.broadcast %20 : vector<1x256xf32> to vector<2x256xf32>
    %139 = arith.mulf %137, %138 : vector<2x256xf32>
    %140 = arith.addf %135, %139 : vector<2x256xf32>
    %141 = vector.extract_strided_slice %111 {offsets = [14, 0], sizes = [2, 256], strides = [1, 1]} : vector<18x256xf32> to vector<2x256xf32>
    %c240_i32_60 = arith.constant 240 : i32
    %142 = tpu.dynamic_rotate %141 by %c240_i32_60 dim 1 : vector<2x256xf32>, i32 -> vector<2x256xf32>
    %143 = arith.addf %140, %142 : vector<2x256xf32>
    %144 = vector.extract_strided_slice %111 {offsets = [16, 0], sizes = [2, 256], strides = [1, 1]} : vector<18x256xf32> to vector<2x256xf32>
    %c239_i32_61 = arith.constant 239 : i32
    %145 = tpu.dynamic_rotate %144 by %c239_i32_61 dim 1 : vector<2x256xf32>, i32 -> vector<2x256xf32>
    %146 = vector.broadcast %25 : vector<1x256xf32> to vector<2x256xf32>
    %147 = arith.mulf %145, %146 : vector<2x256xf32>
    %148 = arith.addf %143, %147 : vector<2x256xf32>
    %149 = vector.extract_strided_slice %148 {offsets = [0, 32], sizes = [2, 128], strides = [1, 1]} : vector<2x256xf32> to vector<2x128xf32>
    %c0_62 = arith.constant 0 : index
    %c0_63 = arith.constant 0 : index
    %150 = vector.load %arg6[%c0_62, %c0_63] : memref<2x1xf32, #tpu.memory_space<vmem>>, vector<2x1xf32>
    %151 = vector.broadcast %150 : vector<2x1xf32> to vector<2x128xf32>
    %152 = arith.addf %149, %151 : vector<2x128xf32>
    %c0_64 = arith.constant 0 : index
    %c0_65 = arith.constant 0 : index
    %c0_66 = arith.constant 0 : index
    %153 = vector.load %arg8[%c0_64, %c0_65, %c0_66] : memref<1x2x128xf32, #tpu.memory_space<vmem>>, vector<1x2x128xf32>
    %154 = vector.shape_cast %153 : vector<1x2x128xf32> to vector<2x128xf32>
    %155 = vector.shape_cast %152 : vector<2x128xf32> to vector<1x2x128xf32>
    tpu.vector_store %arg8[%c0_64, %c0_65, %c0_66], %155 {strides = array<i32>} : memref<1x2x128xf32, #tpu.memory_space<vmem>>, vector<1x2x128xf32>,
    return
  }
  func.func @transform_0(%arg0: i32, %arg1: i32) -> (i32, i32, i32, i32) {
    %c0_i32 = arith.constant 0 : i32
    %c0_i32_0 = arith.constant 0 : i32
    %c0_i32_1 = arith.constant 0 : i32
    return %arg0, %arg1, %c0_i32, %c0_i32_0 : i32, i32, i32, i32
  }
  func.func @transform_1(%arg0: i32, %arg1: i32) -> (i32, i32, i32) {
    %c0_i32 = arith.constant 0 : i32
    %c0_i32_0 = arith.constant 0 : i32
    %c0_i32_1 = arith.constant 0 : i32
    %c0_i32_2 = arith.constant 0 : i32
    return %c0_i32, %c0_i32_0, %c0_i32_1 : i32, i32, i32
  }
  func.func @transform_2(%arg0: i32, %arg1: i32) -> (i32, i32) {
    %c0_i32 = arith.constant 0 : i32
    %c0_i32_0 = arith.constant 0 : i32
    %c0_i32_1 = arith.constant 0 : i32
    return %c0_i32, %c0_i32_0 : i32, i32
  }
  func.func @transform_3(%arg0: i32, %arg1: i32) -> (i32, i32) {
    %c0_i32 = arith.constant 0 : i32
    %c0_i32_0 = arith.constant 0 : i32
    %c0_i32_1 = arith.constant 0 : i32
    return %c0_i32, %c0_i32_0 : i32, i32
  }
  func.func @transform_4(%arg0: i32, %arg1: i32) -> (i32, i32) {
    %c0_i32 = arith.constant 0 : i32
    %c0_i32_0 = arith.constant 0 : i32
    %c0_i32_1 = arith.constant 0 : i32
    return %c0_i32, %c0_i32_0 : i32, i32
  }
  func.func @transform_5(%arg0: i32, %arg1: i32) -> (i32, i32) {
    %c0_i32 = arith.constant 0 : i32
    %c0_i32_0 = arith.constant 0 : i32
    %c0_i32_1 = arith.constant 0 : i32
    return %c0_i32, %c0_i32_0 : i32, i32
  }
  func.func @transform_6(%arg0: i32, %arg1: i32) -> (i32, i32, i32) {
    %c0_i32 = arith.constant 0 : i32
    %c0_i32_0 = arith.constant 0 : i32
    return %arg0, %c0_i32, %arg1 : i32, i32, i32
  }
}

</mosaic_0001>

<bundles_post_ra>
// kernel: tpu_custom_call.1
= control target key start
LH: loop header
LB: loop body
LE: loop exit
PB: predicated region body
PF: predicated region fallthrough
CT: control target
= control target key end

     0   :  { %11 = vsyncpa [#allocation3], 0  ;;  %s1924_s0 = inlined_call_operand.vmem [shape: f32[2,2,8,256], index: 0, kind: input, shape index: {}]   ;;  %s1925_s1 = inlined_call_operand.vmem [shape: bf16[9,16,8], index: 1, kind: input, shape index: {}]   ;;  %s1926_s2 = inlined_call_operand.vmem [shape: f32[16,1], index: 2, kind: input, shape index: {}]   ;;  %s1927_s3 = inlined_call_operand.vmem [shape: bf16[18,16], index: 3, kind: input, shape index: {}]   ;;  %s1928_s4 = inlined_call_operand.vmem [shape: f32[2,1], index: 4, kind: input, shape index: {}]   ;;  %s1929_s5 = inlined_call_operand.vmem [shape: s32[2,256], index: 5, kind: input, shape index: {}]   ;;  %s1930_s6 = inlined_call_operand.hbm [shape: f32[2,2,256], index: 6, kind: output, shape index: {}]  }
   0x1   :  { %13 = vsyncpa [#allocation3 + $0x1], 0  ;;  %s1555_s21 = smov 0   ;;  %s1557_s22 = smov 0  }
   0x2   :  { %s1559_s23 = smov 0   ;;  %s1561_s24 = smov 0  }
   0x3   :  { %s1563_s25 = smov 0   ;;  %s1565_s26 = smov 0  }
   0x4   :  { %s1567_s27 = smov 0   ;;  %s1569_s28 = smov 0  }
   0x5 LB: > { %s1184_s29 = sadd.s32 4294967295, %s1507_s28   ;;  %s1185_s30 = sadd.s32 4294967294, %s1507_s28   ;;  %s1507_s28 = sphi %s1569_s28, %s19_s28   ;;  %s1503_s27 = sphi %s1567_s27, %s1954_s27   ;;  %s1499_s26 = sphi %s1565_s26, %s1953_s26   ;;  %s1495_s25 = sphi %s1563_s25, %s1952_s25   ;;  %s1491_s24 = sphi %s1561_s24, %s1951_s24   ;;  %s1487_s23 = sphi %s1559_s23, %s1950_s23   ;;  %s1483_s22 = sphi %s1557_s22, %s1949_s22   ;;  %s1479_s21 = sphi %s1555_s21, %s1948_s21  }
   0x6   : > { %s28_s7 = sadd.s32 1, %s1499_s26  ;;  %s31_s8 = sadd.s32 1, %s1503_s27 }
   0x7   : > { %p29_p0 = scmp.ge.s32.totalorder %s28_s7, 2  ;;  %p183_p1 = scmp.ne.s32.totalorder %s1487_s23, %s1483_s22 }
   0x8   : > { %p184_p2 = scmp.eq.s32.totalorder %s1184_s29, 3  ;;  %p189_p5 = scmp.ne.s32.totalorder %s1483_s22, %s1479_s21 }
   0x9   : > { %s1956_s7 = smov (%p29_p0, %s28_s7), 0  ;;  %s1958_s8 = smov (!%p29_p0, %s31_s8), %s1503_s27 }
   0xa   : > { %s169_s9 = ssub.s32 %s1499_s26, %s1956_s7  ;;  %p1606_p3 = por %p184_p2, %p183_p1 }
   0xb   : > { %p33_p4 = scmp.ge.s32.totalorder %s1958_s8, 2  ;;  %p190_p6 = scmp.eq.s32.totalorder %s1185_s30, 3 }
   0xc   : > { %p1188_p7 = scmp.ge.s32.totalorder %s1507_s28, 1  ;;  %p235_p9 = scmp.lt.s32.totalorder %s1507_s28, 5 }
   0xd   : > { %s1960_s8 = smov (%p33_p4, %s1958_s8), 0  ;;  %p1615_p8 = por %p190_p6, %p189_p5 }
   0xe   : > { %1941 = sst [smem:[#allocation5_spill]] %s1960_s8  ;;  %s168_s12 = ssub.s32 %s1503_s27, %s1960_s8 }
   0xf   : > { %s173_s13 = sadd.s32 1, %s1487_s23  ;;  %s170_s14 = sor.u32 %s169_s9, %s168_s12 }
  0x10   : > { %p236_p10 = pnand %p1188_p7, %p235_p9  ;;  %p171_p11 = scmp.eq.s32.totalorder %s170_s14, 0 }
  0x11   : > { %p269_p12 = scmp.lt.s32.totalorder (!%p236_p10), %s1495_s25, 1  ;;  %p271_p13 = scmp.lt.s32.totalorder (!%p236_p10), %s1491_s24, 1 }
  0x12   : > { %s1624_s15 = scalar_select %p171_p11, %s1487_s23, %s173_s13  }
  0x13   : > { %239 = sbr.rel (%p236_p10) target bundleno = 788 (0x314), region = 44  ;;  %s1509_s12 = smov (!%p236_p10), 16  }
  0x14   : > { %s1510_s13 = smov (!%p236_p10), 15   ;;  %s1936_s14 = smov (!%p236_p10), 127  }
  0x15   : > { %s1513_s8 = smov (!%p236_p10), 1  }
  0x18   : > { %s270_s16 = scalar_select %p269_p12, %s1495_s25, 1  ;;  %v1193_v3 = vld [vmem:[%s1929_s5 + $0x1] ss:$2 sm:$0x3]  ;;  %v1517_v4 = vmov 0.0   ;;  %v304_v18 = vlaneseq  ;;  %vm354_vm3 = vcmask 1043456  }
  0x19   : > { %s272_s17 = scalar_select %p271_p13, %s1491_s24, 1  ;;  %vm292_vm0 = vcmp.le.s32.totalorder %v1193_v3, 14  ;;  %vm284_vm1 = vcmp.ge.s32.totalorder %v1193_v3, 1  ;;  %vm350_vm7 = vcmask 64512   ;;  %v1280_v54 = vld [vmem:[%s1925_s1 + $0x8] sm:$0xff]  ;;  %vm920_vm15 = vcmask 130048  }
  0x1a   : > { %s1191_s18 = sshll.u32 %s270_s16, 2  ;;  %s1512_s16 = smov 17   ;;  %v293_v5 = vsel %vm292_vm0, 1.0, %v1517_v4  ;;  %v285_v6 = vsel %vm284_vm1, 1.0, %v1517_v4  ;;  %v1664_v23 = vand.u32 127, %v304_v18  ;;  %vm1081_vm0 = vcmask 785408  }
  0x1b   : > { %s1190_s19 = sshll.u32 %s272_s17, 1  ;;  %s1938_s17 = smov 113   ;;  %v1652_v7 = vperm.slane %v293_v5, 0  ;;  %v1654_v8 = vperm.slane %v293_v5, 1  ;;  %v1656_v9 = vperm.slane %v285_v6, 0  ;;  %v1658_v10 = vperm.slane %v285_v6, 1 }
  0x1c   : > { %s275_s20 = sadd.s32 %s1191_s18, %s1190_s19  ;;  %s1932_s18 = smov 111   ;;  %vm337_vm2 = vcmp.lt.s32.totalorder %v1664_v23, 16  ;;  %vm435_vm4 = vcmp.lt.s32.totalorder %v1664_v23, 15  ;;  %vm627_vm5 = vcmp.lt.s32.totalorder %v1664_v23, 127  ;;  %vm306_vm6 = vcmp.lt.s32.totalorder %v1664_v23, 17 }
  0x1d   : > { %s1192_s29 = sshll.u32 %s275_s20, 3  ;;  %s1934_s19 = smov 112   ;;  %v299_v11 = vpack.c.bf16 %v1654_v8, %v1652_v7  ;;  %v291_v12 = vpack.c.bf16 %v1658_v10, %v1656_v9  ;;  %vm513_vm8 = vcmp.lt.s32.totalorder %v1664_v23, 1  ;;  %vm690_vm9 = vcmp.lt.s32.totalorder %v1664_v23, 113 }
  0x1e   : > { %s277_s9 = scalar_lea.vmem %s1924_s0, %s1192_s29  ;;  %vm811_vm10 = vcmp.lt.s32.totalorder %v1664_v23, 111  ;;  %vm753_vm11 = vcmp.lt.s32.totalorder %v1664_v23, 112  ;;  %s266_s20 = sand.u32 1, %s1483_s22  }
  0x1f   : > { %v1633_v0 = vld [vmem:[%s277_s9] sm:$0xff]  ;;  %v1635_v1 = vld [vmem:[%s277_s9 + $0x8] sm:$0xff]  ;;  %v440_v13 = vunpack.c.l.b16 %v299_v11  ;;  %v311_v14 = vunpack.c.l.b16 %v291_v12  ;;  %v441_v15 = vunpack.c.h.b16 %v299_v11  ;;  %v312_v16 = vunpack.c.h.b16 %v291_v12  ;;  %s1189_s30 = sshll.u32 %s266_s20, 1 }
  0x20   : > { %v1371_v2 = vpack.i.bf16 %v1635_v1, %v1633_v0  ;;  %v572_v41 = vpack.c.bf16 %v1633_v0, %v1633_v0 }
  0x21   : > { %v442_v17 = vpack.c.b16 %v440_v13, %v440_v13  ;;  %v313_v19 = vpack.c.b16 %v311_v14, %v311_v14  ;;  %v443_v20 = vpack.c.b16 %v441_v15, %v441_v15  ;;  %v314_v21 = vpack.c.b16 %v312_v16, %v312_v16 }
  0x22   : > { %1372 = vrot.lane.b32.xlu0 %v1371_v2, %s1509_s12  ;;  %1382 = vrot.lane.b32.xlu1 %v1371_v2, %s1510_s13  ;;  %v586_v59 = vsel %vm354_vm3, %v572_v41, 0 }
  0x23   : > { %1392 = vrot.lane.b32.xlu2 %v1371_v2, %s1936_s14  ;;  %v445_v22 = vpack.i.b16 %v442_v17, %v442_v17  ;;  %v316_v24 = vpack.i.b16 %v313_v19, %v313_v19  ;;  %v449_v25 = vpack.i.b16 %v443_v20, %v443_v20  ;;  %v320_v26 = vpack.i.b16 %v314_v21, %v314_v21  ;;  %s1264_s14 = sshll.u32 %s1491_s24, 3 }
  0x25   : > { %v447_v27 = vperm.slane %v445_v22, 0  ;;  %v318_v31 = vperm.slane %v316_v24, 0  ;;  %v451_v32 = vperm.slane %v449_v25, 0  ;;  %v322_v39 = vperm.slane %v320_v26, 0 }
  0x27   : > { %v1668_v40 = vunpack.c.l.bf16 %v447_v27  ;;  %v1681_v49 = vunpack.c.l.bf16 %v451_v32  ;;  %v325_v57 = vunpack.c.l.bf16 %v318_v31  ;;  %v1693_v58 = vunpack.c.l.bf16 %v322_v39 }
  0x28   : > { %v573_v27 = vpack.c.bf16 %v1635_v1, %v1635_v1 }
  0x2a   : > { %1377 = vrot.lane.b32.xlu0 %v1371_v2, %s1512_s16  ;;  %1387 = vrot.lane.b32.xlu1 %v1371_v2, %s1513_s8 }
  0x2b   : > { %1397 = vrot.lane.b32.xlu2 %v1371_v2, %s1938_s17  ;;  %s1265_s17 = sadd.s32 4294967294, %s1264_s14  ;;  %s1945_s14 = smov 112  }
  0x32   : > { %1407 = vrot.lane.b32.xlu1 %v1371_v2, %s1932_s18  ;;  %1402 = vrot.lane.b32.xlu0 %v1371_v2, %s1934_s19  ;;  %s1519_s18 = smov 96   ;;  %s1275_s19 = sshll.u32 %s1495_s25, 1 }
  0x33   : > { %s1096_s29 = sadd.s32 %s1491_s24, %s1275_s19  ;;  %s1086_s25 = scalar_lea.sflag [#allocation3], %s266_s20 }
  0x34   : > { %s1276_s9 = sshll.u32 %s1096_s29, 1 }
  0x7d   : > { %v1393_v28 = vpop.permute.xlu2 %1392 }
  0x7e   : > { %v1395_v33 = vunpack.i.h.bf16 %v1393_v28  ;;  %v1394_v34 = vunpack.i.l.bf16 %v1393_v28 }
  0x80   : > { %v628_v50 = vsel %vm627_vm5, %v1394_v34, %v1395_v33  ;;  %v629_v51 = vsel %vm627_vm5, %v1395_v33, %v1394_v34  ;;  %v589_v34 = vsel %vm354_vm3, %v573_v27, 0 }
  0x81   : > { %v630_v0 = vpack.c.bf16 %v629_v51, %v628_v50 }
  0x83   : > { %v631_v28 = vunpack.c.l.bf16 %v630_v0 }
  0x85   : > { %v1398_v11 = vpop.permute.xlu2 %1397 }
  0x86   : > { %v1400_v14 = vunpack.i.h.bf16 %v1398_v11  ;;  %v1399_v15 = vunpack.i.l.bf16 %v1398_v11 }
  0x88   : > { %v691_v25 = vsel %vm690_vm9, %v1399_v15, %v1400_v14  ;;  %v692_v26 = vsel %vm690_vm9, %v1400_v14, %v1399_v15 }
  0x89   : > { %v693_v33 = vpack.c.bf16 %v692_v26, %v691_v25  ;;  %v1283_v25 = vld [vmem:[%s1925_s1 + $0x20] sm:$0xff] }
  0x94   : > { %v1373_v29 = vpop.permute.xlu0 %1372  ;;  %v1383_v30 = vpop.permute.xlu1 %1382 }
  0x95   : > { %v1375_v35 = vunpack.i.h.bf16 %v1373_v29  ;;  %v1374_v36 = vunpack.i.l.bf16 %v1373_v29  ;;  %v1385_v37 = vunpack.i.h.bf16 %v1383_v30  ;;  %v1384_v38 = vunpack.i.l.bf16 %v1383_v30 }
  0x97   : > { %v339_v42 = vsel %vm337_vm2, %v1375_v35, %v1374_v36  ;;  %v338_v43 = vsel %vm337_vm2, %v1374_v36, %v1375_v35  ;;  %v436_v44 = vsel %vm435_vm4, %v1384_v38, %v1385_v37  ;;  %v437_v45 = vsel %vm435_vm4, %v1385_v37, %v1384_v38 }
  0x98   : > { %v340_v46 = vpack.c.bf16 %v339_v42, %v339_v42  ;;  %v341_v47 = vpack.c.bf16 %v338_v43, %v338_v43  ;;  %v438_v48 = vpack.c.bf16 %v436_v44, %v437_v45  ;;  %v633_v35 = vmul.f32 %v631_v28, %v1668_v40 }
  0x99   : > { %v632_v36 = vunpack.c.h.bf16 %v630_v0  ;;  %v694_v43 = vunpack.c.l.bf16 %v693_v33 }
  0x9a   : > { %v356_v52 = vsel %vm354_vm3, %v340_v46, 0  ;;  %v359_v53 = vsel %vm354_vm3, %v341_v47, 0  ;;  %v452_v55 = vunpack.c.l.bf16 %v438_v48  ;;  %v453_v56 = vunpack.c.h.bf16 %v438_v48 }
  0x9b   : > { %368 = vmatpush.bf16.msra.mxu0 %v356_v52  ;;  %382 = vmatpush.bf16.msra.mxu1 %v359_v53  ;;  %v635_v1 = vpack.c.bf16 %v633_v35, %v633_v35  ;;  %v634_v42 = vmul.f32 %v632_v36, %v1681_v49  ;;  %v696_v50 = vmul.f32 %v694_v43, %v325_v57  ;;  %v1279_v53 = vld [vmem:[%s1925_s1] sm:$0xff]  ;;  %v1285_v35 = vld [vmem:[%s1925_s1 + $0x30] sm:$0xff]  ;;  %v1286_v36 = vld [vmem:[%s1925_s1 + $0x38] sm:$0xff] }
  0x9c   : > { %v1378_v60 = vpop.permute.xlu0 %1377  ;;  %v456_v61 = vmul.f32 %v1668_v40, %v452_v55  ;;  %v1388_v62 = vpop.permute.xlu1 %1387  ;;  %v457_v63 = vmul.f32 %v1681_v49, %v453_v56 }
  0x9d   : > { %v1380_v2 = vunpack.i.h.bf16 %v1378_v60  ;;  %v1379_v3 = vunpack.i.l.bf16 %v1378_v60  ;;  %v1390_v5 = vunpack.i.h.bf16 %v1388_v62  ;;  %v1389_v6 = vunpack.i.l.bf16 %v1388_v62 }
  0x9e   : > { %1200 = vmatmul.msk.bf16.vlgmr.msra.gmra.mxu0 %vm350_vm7, %v1280_v54  ;;  %1201 = vmatmul.msk.bf16.vlgmr.msra.gmra.mxu1 %vm350_vm7, %v1280_v54  ;;  %v458_v12 = vpack.c.bf16 %v456_v61, %v456_v61  ;;  %v459_v13 = vpack.c.bf16 %v457_v63, %v457_v63  ;;  %v636_v48 = vpack.c.bf16 %v634_v42, %v634_v42  ;;  %v695_v61 = vunpack.c.h.bf16 %v693_v33 }
  0x9f   : > { %v307_v16 = vsel %vm306_vm6, %v1379_v3, %v1380_v2  ;;  %v308_v17 = vsel %vm306_vm6, %v1380_v2, %v1379_v3  ;;  %v514_v18 = vsel %vm513_vm8, %v1389_v6, %v1390_v5  ;;  %v515_v19 = vsel %vm513_vm8, %v1390_v5, %v1389_v6 }
  0xa0   : > { %v309_v20 = vpack.c.bf16 %v307_v16, %v308_v17  ;;  %v472_v21 = vsel %vm354_vm3, %v458_v12, 0  ;;  %v475_v22 = vsel %vm354_vm3, %v459_v13, 0  ;;  %v516_v24 = vpack.c.bf16 %v514_v18, %v515_v19 }
  0xa1   : > { %484 = vmatpush.bf16.msrb.mxu0 %v472_v21  ;;  %498 = vmatpush.bf16.msrb.mxu1 %v475_v22  ;;  %v698_v56 = vpack.c.bf16 %v696_v50, %v696_v50  ;;  %v652_v60 = vsel %vm354_vm3, %v636_v48, 0  ;;  %v697_v0 = vmul.f32 %v695_v61, %v1693_v58  ;;  %v1282_v22 = vld [vmem:[%s1925_s1 + $0x18] sm:$0xff]  ;;  %v1518_v33 = vmov 0  }
  0xa2   : > { %v323_v29 = vunpack.c.l.bf16 %v309_v20  ;;  %v324_v30 = vunpack.c.h.bf16 %v309_v20  ;;  %v517_v31 = vunpack.c.l.bf16 %v516_v24  ;;  %v518_v32 = vunpack.c.h.bf16 %v516_v24  ;;  %1412 = vset.pattern.permute.xlu0 %v1518_v33  ;;  %1411 = vset.pattern.permute.xlu2 %v1518_v33 }
  0xa3   : > { %v712_v62 = vsel %vm354_vm3, %v698_v56, 0  ;;  %v699_v5 = vpack.c.bf16 %v697_v0, %v697_v0 }
  0xa4   : > { %v327_v37 = vmul.f32 %v325_v57, %v323_v29  ;;  %v328_v38 = vmul.f32 %v1693_v58, %v324_v30  ;;  %v519_v39 = vmul.f32 %v517_v31, %v325_v57  ;;  %v520_v41 = vmul.f32 %v518_v32, %v1693_v58  ;;  %v1408_v63 = vpop.permute.xlu1 %1407  ;;  %v1403_v6 = vpop.permute.xlu0 %1402  ;;  %v871_v31 = vld [vmem:[%s1926_s2 + $0x8] sm:$0xff]  ;;  %v870_v32 = vld [vmem:[%s1926_s2] sm:$0xff] }
  0xa5   : > { %598 = vmatpush.bf16.msra.mxu0 %v586_v59  ;;  %612 = vmatpush.bf16.msra.mxu1 %v589_v34  ;;  %v1281_v59 = vld [vmem:[%s1925_s1 + $0x10] sm:$0xff]  ;;  %v649_v57 = vsel %vm354_vm3, %v635_v1, 0  ;;  %v1410_v2 = vunpack.i.h.bf16 %v1408_v63  ;;  %v1409_v3 = vunpack.i.l.bf16 %v1408_v63  ;;  %v1405_v13 = vunpack.i.h.bf16 %v1403_v6  ;;  %v1284_v34 = vld [vmem:[%s1925_s1 + $0x28] sm:$0xff] }
  0xa6   : > { %v329_v44 = vpack.c.bf16 %v327_v37, %v327_v37  ;;  %v330_v45 = vpack.c.bf16 %v328_v38, %v328_v38  ;;  %v521_v46 = vpack.c.bf16 %v519_v39, %v519_v39  ;;  %v522_v47 = vpack.c.bf16 %v520_v41, %v520_v41  ;;  %879 = vperm.xlu0 %1412, %v871_v31   ;;  %v1287_v37 = vld [vmem:[%s1925_s1 + $0x40] sm:$0xff] }
  0xa7   : > { %v812_v11 = vsel %vm811_vm10, %v1409_v3, %v1410_v2  ;;  %v813_v12 = vsel %vm811_vm10, %v1410_v2, %v1409_v3  ;;  %v1404_v14 = vunpack.i.l.bf16 %v1403_v6  ;;  %v715_v15 = vsel %vm354_vm3, %v699_v5, 0  ;;  %874 = vperm.xlu2 %1411, %v870_v32  }
  0xa8   : > { %v398_v51 = vsel %vm354_vm3, %v329_v44, 0  ;;  %v401_v52 = vsel %vm354_vm3, %v330_v45, 0  ;;  %v535_v54 = vsel %vm354_vm3, %v521_v46, 0  ;;  %v538_v55 = vsel %vm354_vm3, %v522_v47, 0 }
  0xa9   : > { %410 = vmatpush.bf16.msra.mxu2 %v398_v51  ;;  %424 = vmatpush.bf16.msra.mxu3 %v401_v52  ;;  %v814_v58 = vpack.c.bf16 %v813_v12, %v812_v11  ;;  %v754_v17 = vsel %vm753_vm11, %v1404_v14, %v1405_v13  ;;  %v755_v18 = vsel %vm753_vm11, %v1405_v13, %v1404_v14 }
  0xaa   : > { %v756_v20 = vpack.c.bf16 %v754_v17, %v754_v17  ;;  %v757_v21 = vpack.c.bf16 %v755_v18, %v755_v18 }
  0xab   : > { %v815_v16 = vunpack.c.l.bf16 %v814_v58  ;;  %v816_v28 = vunpack.c.h.bf16 %v814_v58 }
  0xac   : > { %1206 = vmatmul.msk.bf16.vlgmr.msra.gmra.mxu2 %vm350_vm7, %v1279_v53  ;;  %1207 = vmatmul.msk.bf16.vlgmr.msra.gmra.mxu3 %vm350_vm7, %v1279_v53  ;;  %v770_v26 = vsel %vm354_vm3, %v756_v20, 0  ;;  %v773_v27 = vsel %vm354_vm3, %v757_v21, 0 }
  0xad   : > { %547 = vmatpush.bf16.msrb.mxu2 %v535_v54  ;;  %561 = vmatpush.bf16.msrb.mxu3 %v538_v55  ;;  %v817_v19 = vmul.f32 %v815_v16, %v1668_v40  ;;  %v818_v29 = vmul.f32 %v816_v28, %v1681_v49 }
  0xae   : > { %1214 = vmatmul.msk.bf16.vlgmr.msrb.gmra.mxu0 %vm350_vm7, %v1281_v59  ;;  %1215 = vmatmul.msk.bf16.vlgmr.msrb.gmra.mxu1 %vm350_vm7, %v1281_v59 }
  0xaf   : > { %724 = vmatpush.bf16.msrb.mxu0 %v712_v62  ;;  %738 = vmatpush.bf16.msrb.mxu1 %v715_v15  ;;  %v819_v24 = vpack.c.bf16 %v817_v19, %v817_v19  ;;  %v820_v30 = vpack.c.bf16 %v818_v29, %v818_v29 }
  0xb1   : > { %661 = vmatpush.bf16.msra.mxu2 %v649_v57  ;;  %675 = vmatpush.bf16.msra.mxu3 %v652_v60  ;;  %v833_v40 = vsel %vm354_vm3, %v819_v24, 0  ;;  %v836_v49 = vsel %vm354_vm3, %v820_v30, 0  ;;  %v281_v24 = vld [vmem:[%s1929_s5] ss:$2 sm:$0x3] }
  0xbc   : > { %1222 = vmatmul.msk.bf16.vlgmr.msrb.gmra.mxu2 %vm350_vm7, %v1282_v22  ;;  %1223 = vmatmul.msk.bf16.vlgmr.msrb.gmra.mxu3 %vm350_vm7, %v1282_v22 }
  0xbd   : > { %782 = vmatpush.bf16.msrb.mxu2 %v770_v26  ;;  %796 = vmatpush.bf16.msrb.mxu3 %v773_v27 }
  0xbe   : > { %1230 = vmatmul.msk.bf16.vlgmr.msra.gmra.mxu0 %vm350_vm7, %v1283_v25  ;;  %1231 = vmatmul.msk.bf16.vlgmr.msra.gmra.mxu1 %vm350_vm7, %v1283_v25  ;;  %v892_v25 = vstv %s1265_s17  ;;  %s1946_s17 = smov 111  }
  0xbf   : > { %845 = vmatpush.bf16.msra.mxu0 %v833_v40  ;;  %859 = vmatpush.bf16.msra.mxu1 %v836_v49  ;;  %v893_v40 = vadd.s32 %v892_v25, %v281_v24 }
  0xc1   : > { %vm894_vm12 = vcmp.ge.s32.totalorder %v893_v40, 0  ;;  %vm895_vm13 = vcmp.le.s32.totalorder %v893_v40, 15 }
  0xc2   : > { %vm896_vm14 = vmand %vm894_vm12, %vm895_vm13 }
  0xcc   : > { %1238 = vmatmul.msk.bf16.vlgmr.msra.gmra.mxu2 %vm350_vm7, %v1284_v34  ;;  %1239 = vmatmul.msk.bf16.vlgmr.msra.gmra.mxu3 %vm350_vm7, %v1284_v34 }
  0xce   : > { %1246 = vmatmul.msk.bf16.vlgmr.msrb.gmra.mxu0 %vm350_vm7, %v1285_v35  ;;  %1247 = vmatmul.msk.bf16.vlgmr.msrb.gmra.mxu1 %vm350_vm7, %v1285_v35 }
  0xdc   : > { %1254 = vmatmul.msk.bf16.vlgmr.msrb.gmra.mxu2 %vm350_vm7, %v1286_v36  ;;  %1255 = vmatmul.msk.bf16.vlgmr.msrb.gmra.mxu3 %vm350_vm7, %v1286_v36 }
  0xde   : > { %1262 = vmatmul.msk.bf16.vlgmr.msra.gmra.mxu0 %vm350_vm7, %v1287_v37  ;;  %1263 = vmatmul.msk.bf16.vlgmr.msra.gmra.mxu1 %vm350_vm7, %v1287_v37 }
 0x11b   : > { %v370_v38 = vpop.f32.mrf.mxu0  ;;  %v384_v39 = vpop.f32.mrf.mxu1 }
 0x123   : > { %v372_v41 = vpop.f32.mrf.mxu0  ;;  %v386_v1 = vpop.f32.mrf.mxu1 }
 0x12b   : > { %v486_v42 = vpop.f32.mrf.mxu0  ;;  %v500_v43 = vpop.f32.mrf.mxu1 }
 0x12f   : > { %v412_v44 = vpop.f32.mrf.mxu2  ;;  %v426_v45 = vpop.f32.mrf.mxu3 }
 0x130   : > { %v413_v62 = vadd.f32 %v412_v44, %v370_v38  ;;  %v427_v63 = vadd.f32 %v426_v45, %v384_v39  ;;  %v897_v45 = vsel %vm896_vm14, 1.0, %v1517_v4 }
 0x132   : > { %v506_v3 = vadd.f32 %v500_v43, %v427_v63  ;;  %v505_v5 = vadd.f32 %v486_v42, %v413_v62 }
 0x133   : > { %v488_v46 = vpop.f32.mrf.mxu0  ;;  %v502_v47 = vpop.f32.mrf.mxu1 }
 0x137   : > { %v414_v48 = vpop.f32.mrf.mxu2  ;;  %v428_v50 = vpop.f32.mrf.mxu3 }
 0x138   : > { %v429_v14 = vadd.f32 %v428_v50, %v386_v1  ;;  %v415_v58 = vadd.f32 %v414_v48, %v372_v41  ;;  %v875_v1 = vpop.permute.xlu2 %874 }
 0x13a   : > { %v508_v19 = vadd.f32 %v502_v47, %v429_v14  ;;  %v507_v20 = vadd.f32 %v488_v46, %v415_v58  ;;  %v911_v14 = vld [vmem:[%s1927_s3 + $0x8] sm:$0x1] }
 0x13b   : > { %v600_v51 = vpop.f32.mrf.mxu0  ;;  %v614_v52 = vpop.f32.mrf.mxu1  ;;  %v917_v58 = vunpack.c.l.b16 %v911_v14 }
 0x13f   : > { %v549_v53 = vpop.f32.mrf.mxu2  ;;  %v563_v54 = vpop.f32.mrf.mxu3 }
 0x140   : > { %v568_v11 = vadd.f32 %v549_v53, %v505_v5  ;;  %v569_v12 = vadd.f32 %v563_v54, %v506_v3  ;;  %v880_v54 = vpop.permute.xlu0 %879 }
 0x142   : > { %v620_v17 = vadd.f32 %v614_v52, %v569_v12  ;;  %v619_v18 = vadd.f32 %v600_v51, %v568_v11 }
 0x143   : > { %v602_v55 = vpop.f32.mrf.mxu0  ;;  %v616_v56 = vpop.f32.mrf.mxu1 }
 0x147   : > { %v551_v59 = vpop.f32.mrf.mxu2  ;;  %v565_v57 = vpop.f32.mrf.mxu3 }
 0x148   : > { %v570_v26 = vadd.f32 %v551_v59, %v507_v20  ;;  %v571_v27 = vadd.f32 %v565_v57, %v508_v19  ;;  %v899_v59 = vperm.slane %v897_v45, 0  ;;  %v900_v57 = vperm.slane %v897_v45, 1 }
 0x14a   : > { %v622_v49 = vadd.f32 %v616_v56, %v571_v27  ;;  %v621_v34 = vadd.f32 %v602_v55, %v570_v26 }
 0x14b   : > { %v726_v60 = vpop.f32.mrf.mxu0  ;;  %v740_v61 = vpop.f32.mrf.mxu1 }
 0x14f   : > { %v663_v0 = vpop.f32.mrf.mxu2  ;;  %v677_v2 = vpop.f32.mrf.mxu3 }
 0x150   : > { %v682_v21 = vadd.f32 %v663_v0, %v619_v18  ;;  %v683_v22 = vadd.f32 %v677_v2, %v620_v17 }
 0x152   : > { %v746_v29 = vadd.f32 %v740_v61, %v683_v22  ;;  %v745_v31 = vadd.f32 %v726_v60, %v682_v21 }
 0x153   : > { %v742_v6 = vpop.f32.mrf.mxu1  ;;  %v728_v13 = vpop.f32.mrf.mxu0 }
 0x157   : > { %v665_v15 = vpop.f32.mrf.mxu2  ;;  %v679_v16 = vpop.f32.mrf.mxu3 }
 0x158   : > { %v684_v37 = vadd.f32 %v665_v15, %v621_v34  ;;  %v685_v38 = vadd.f32 %v679_v16, %v622_v49  ;;  %v919_v15 = vpack.c.b16 %v917_v58, %v917_v58 }
 0x15a   : > { %v748_v42 = vadd.f32 %v742_v6, %v685_v38  ;;  %v747_v43 = vadd.f32 %v728_v13, %v684_v37  ;;  %v1288_v13 = vld [vmem:[%s1927_s3] sm:$0xff] }
 0x15b   : > { %v861_v28 = vpop.f32.mrf.mxu1  ;;  %v847_v30 = vpop.f32.mrf.mxu0 }
 0x15f   : > { %v784_v32 = vpop.f32.mrf.mxu2  ;;  %v798_v33 = vpop.f32.mrf.mxu3 }
 0x160   : > { %v803_v35 = vadd.f32 %v784_v32, %v745_v31  ;;  %v804_v36 = vadd.f32 %v798_v33, %v746_v29 }
 0x162   : > { %v866_v39 = vadd.f32 %v847_v30, %v803_v35  ;;  %v867_v41 = vadd.f32 %v861_v28, %v804_v36  ;;  %v1067_v35 = vld [vmem:[%s1928_s4] sm:$0x3] }
 0x163   : > { %v863_v44 = vpop.f32.mrf.mxu1  ;;  %v849_v53 = vpop.f32.mrf.mxu0 }
 0x164   : > { %v882_v48 = vadd.f32 %v875_v1, %v866_v39  ;;  %v883_v50 = vadd.f32 %v875_v1, %v867_v41 }
 0x166   : > { %v886_v60 = vmax.f32 %v882_v48, 0.0  ;;  %v887_v61 = vmax.f32 %v883_v50, 0.0 }
 0x167   : > { %v786_v46 = vpop.f32.mrf.mxu2  ;;  %v800_v47 = vpop.f32.mrf.mxu3 }
 0x168   : > { %v805_v51 = vadd.f32 %v786_v46, %v747_v43  ;;  %v806_v52 = vadd.f32 %v800_v47, %v748_v42  ;;  %v903_v3 = vmul.f32 %v899_v59, %v886_v60  ;;  %v904_v4 = vmul.f32 %v900_v57, %v887_v61 }
 0x16a   : > { %v868_v55 = vadd.f32 %v849_v53, %v805_v51  ;;  %v869_v56 = vadd.f32 %v863_v44, %v806_v52 }
 0x16c   : > { %v884_v62 = vadd.f32 %v880_v54, %v868_v55  ;;  %v885_v63 = vadd.f32 %v880_v54, %v869_v56 }
 0x16e   : > { %v888_v0 = vmax.f32 %v884_v62, 0.0  ;;  %v889_v2 = vmax.f32 %v885_v63, 0.0 }
 0x170   : > { %v905_v5 = vmul.f32 %v899_v59, %v888_v0  ;;  %v906_v6 = vmul.f32 %v900_v57, %v889_v2 }
 0x172   : > { %v907_v11 = vpack.c.bf16 %v905_v5, %v903_v3  ;;  %v908_v12 = vpack.c.bf16 %v906_v6, %v904_v4 }
 0x174   : > { %934 = vmatpush.bf16.msra.mxu2 %v907_v11  ;;  %952 = vmatpush.bf16.msra.mxu3 %v908_v12 }
 0x177   : > { %1270 = vmatmul.msk.bf16.vlgmr.msra.gmra.mxu2 %vm920_vm15, %v1288_v13  ;;  %1272 = vmatmul.msk.bf16.vlgmr.msra.gmra.mxu3 %vm920_vm15, %v1288_v13 }
 0x187   : > { %1271 = vmatmul.msk.bf16.gmra.mxu2 %vm920_vm15, %v919_v15  ;;  %1273 = vmatmul.msk.bf16.gmra.mxu3 %vm920_vm15, %v919_v15 }
 0x1fa   : > { %v936_v16 = vpop.f32.mrf.mxu2  ;;  %v954_v17 = vpop.f32.mrf.mxu3 }
 0x1fb   : > { %965 = vrot.lane.b32.xlu2 %v954_v17, %s1512_s16  ;;  %963 = vrot.lane.b32.xlu1 %v936_v16, %s1512_s16  ;;  %v985_v18 = vrot.slane %v936_v16, 4  ;;  %v974_v19 = vrot.slane %v954_v17, 2  ;;  %v973_v20 = vrot.slane %v936_v16, 2  ;;  %v1000_v21 = vrot.slane %v954_v17, 6  ;;  %s1943_s16 = smov 113  }
 0x1fc   : > { %v986_v25 = vrot.slane %v954_v17, 4  ;;  %v999_v26 = vrot.slane %v936_v16, 6 }
 0x1fd   : > { %989 = vrot.lane.b32.xlu0 %v985_v18, %s1510_s13 }
 0x202   : > { %v1808_v22 = vpop.f32.mrf.mxu2  ;;  %v1810_v24 = vpop.f32.mrf.mxu3 }
 0x203   : > { %979 = vrot.lane.b32.xlu2 %v974_v19, %s1509_s12  ;;  %977 = vrot.lane.b32.xlu1 %v973_v20, %s1509_s12  ;;  %v1031_v40 = vrot.slane %v1808_v22, 4  ;;  %v1018_v29 = vrot.slane %v1810_v24, 2  ;;  %v1017_v30 = vrot.slane %v1808_v22, 2  ;;  %s1944_s12 = smov 127   ;;  %v1046_v33 = vrot.slane %v1810_v24, 6 }
 0x204   : > { %v1045_v49 = vrot.slane %v1808_v22, 6  ;;  %v1032_v34 = vrot.slane %v1810_v24, 4 }
 0x205   : > { %1005 = vrot.lane.b32.xlu0 %v1000_v21, %s1513_s8 }
 0x20a   : > { %v941_v27 = vpop.f32.mrf.mxu2  ;;  %v959_v28 = vpop.f32.mrf.mxu3 }
 0x20b   : > { %1003 = vrot.lane.b32.xlu2 %v999_v26, %s1513_s8  ;;  %991 = vrot.lane.b32.xlu1 %v986_v25, %s1510_s13  ;;  %s268_s13 = scalar_lea.vmem [#allocation2], %s1189_s30  ;;  %s1433_s30 = scalar_lea.hbm %s1930_s6, 8 }
 0x20c   : > { %s1100_s8 = sshll.u32 %s268_s13, 4  ;;  %s1101_s8 = int_to_ptr.vmem [resolvable:$true] %s1100_s8 }
 0x20d   : > { %1035 = vrot.lane.b32.xlu0 %v1031_v40, %s1943_s16 }
 0x212   : > { %v943_v31 = vpop.f32.mrf.mxu2  ;;  %v961_v32 = vpop.f32.mrf.mxu3 }
 0x213   : > { %1023 = vrot.lane.b32.xlu2 %v1018_v29, %s1944_s12  ;;  %1021 = vrot.lane.b32.xlu1 %v1017_v30, %s1944_s12 }
 0x215   : > { %1051 = vrot.lane.b32.xlu0 %v1046_v33, %s1945_s14 }
 0x21b   : > { %1049 = vrot.lane.b32.xlu2 %v1045_v49, %s1945_s14  ;;  %1037 = vrot.lane.b32.xlu1 %v1032_v34, %s1943_s16  ;;  %s1098_s14 = scalar_lea.hbm %s1930_s6, %s1276_s9 }
 0x21d   : > { %1070 = vperm.xlu0 %1412, %v1067_v35  }
 0x223   : > { %1057 = vrot.lane.b32.xlu1 %v941_v27, %s1946_s17  ;;  %1059 = vrot.lane.b32.xlu2 %v959_v28, %s1946_s17  ;;  %s1102_s17 = sshll.u32 %s1098_s14, 4  ;;  %s1103_s17 = int_to_ptr.hbm [resolvable:$true] %s1102_s17 }
 0x255   : > { %v966_v36 = vpop.permute.xlu2 %965 }
 0x25d   : > { %v980_v37 = vpop.permute.xlu2 %979 }
 0x265   : > { %v1004_v1 = vpop.permute.xlu2 %1003 }
 0x26d   : > { %v964_v38 = vpop.permute.xlu1 %963  ;;  %v1024_v48 = vpop.permute.xlu2 %1023 }
 0x26e   : > { %v967_v44 = vsel %vm306_vm6, %v964_v38, %v966_v36  ;;  %v968_v45 = vsel %vm306_vm6, %v966_v36, %v964_v38 }
 0x26f   : > { %v990_v39 = vpop.permute.xlu0 %989  ;;  %v969_v52 = vmul.f32 %v968_v45, %v1656_v9  ;;  %v970_v53 = vmul.f32 %v967_v44, %v1658_v10 }
 0x275   : > { %v978_v41 = vpop.permute.xlu1 %977  ;;  %v1050_v6 = vpop.permute.xlu2 %1049 }
 0x276   : > { %v981_v50 = vsel %vm337_vm2, %v978_v41, %v980_v37  ;;  %v982_v51 = vsel %vm337_vm2, %v980_v37, %v978_v41 }
 0x277   : > { %v1006_v42 = vpop.permute.xlu0 %1005  ;;  %v983_v56 = vadd.f32 %v982_v51, %v969_v52  ;;  %v984_v59 = vadd.f32 %v981_v50, %v970_v53 }
 0x278   : > { %v1007_v60 = vsel %vm513_vm8, %v1004_v1, %v1006_v42  ;;  %v1008_v61 = vsel %vm513_vm8, %v1006_v42, %v1004_v1 }
 0x279   : > { %v1009_v2 = vmul.f32 %v1008_v61, %v1656_v9  ;;  %v1010_v3 = vmul.f32 %v1007_v60, %v1658_v10 }
 0x27d   : > { %v992_v43 = vpop.permute.xlu1 %991  ;;  %v1060_v40 = vpop.permute.xlu2 %1059 }
 0x27e   : > { %v993_v46 = vsel %vm435_vm4, %v990_v39, %v992_v43  ;;  %v994_v47 = vsel %vm435_vm4, %v992_v43, %v990_v39 }
 0x27f   : > { %v995_v54 = vmul.f32 %v994_v47, %v1652_v7  ;;  %v996_v55 = vmul.f32 %v993_v46, %v1654_v8  ;;  %v1036_v62 = vpop.permute.xlu0 %1035 }
 0x281   : > { %v997_v63 = vadd.f32 %v995_v54, %v983_v56  ;;  %v998_v0 = vadd.f32 %v996_v55, %v984_v59 }
 0x283   : > { %v1011_v11 = vadd.f32 %v1009_v2, %v997_v63  ;;  %v1012_v12 = vadd.f32 %v1010_v3, %v998_v0 }
 0x285   : > { %v1022_v57 = vpop.permute.xlu1 %1021  ;;  %v1014_v17 = vadd.f32 %v1012_v12, %v1810_v24  ;;  %v1013_v18 = vadd.f32 %v1011_v11, %v1808_v22 }
 0x286   : > { %v1025_v4 = vsel %vm627_vm5, %v1022_v57, %v1024_v48  ;;  %v1026_v5 = vsel %vm627_vm5, %v1024_v48, %v1022_v57 }
 0x287   : > { %v1027_v13 = vmul.f32 %v1025_v4, %v1652_v7  ;;  %v1028_v14 = vmul.f32 %v1026_v5, %v1654_v8  ;;  %v1052_v21 = vpop.permute.xlu0 %1051 }
 0x288   : > { %v1053_v30 = vsel %vm753_vm11, %v1050_v6, %v1052_v21  ;;  %v1054_v24 = vsel %vm753_vm11, %v1052_v21, %v1050_v6 }
 0x289   : > { %v1029_v25 = vadd.f32 %v1027_v13, %v1013_v18  ;;  %v1030_v26 = vadd.f32 %v1028_v14, %v1014_v17 }
 0x28d   : > { %v1038_v58 = vpop.permute.xlu1 %1037 }
 0x28e   : > { %v1039_v15 = vsel %vm690_vm9, %v1036_v62, %v1038_v58  ;;  %v1040_v16 = vsel %vm690_vm9, %v1038_v58, %v1036_v62 }
 0x28f   : > { %v1041_v19 = vmul.f32 %v1039_v15, %v1656_v9  ;;  %v1042_v20 = vmul.f32 %v1040_v16, %v1658_v10  ;;  %v1071_v35 = vpop.permute.xlu0 %1070 }
 0x291   : > { %v1043_v27 = vadd.f32 %v1041_v19, %v1029_v25  ;;  %v1044_v28 = vadd.f32 %v1042_v20, %v1030_v26 }
 0x293   : > { %v1055_v22 = vadd.f32 %v1053_v30, %v1043_v27  ;;  %v1056_v31 = vadd.f32 %v1054_v24, %v1044_v28 }
 0x295   : > { %v1058_v29 = vpop.permute.xlu1 %1057 }
 0x296   : > { %v1061_v9 = vsel %vm811_vm10, %v1058_v29, %v1060_v40  ;;  %v1062_v10 = vsel %vm811_vm10, %v1060_v40, %v1058_v29 }
 0x297   : > { %v1063_v32 = vmul.f32 %v1061_v9, %v1652_v7  ;;  %v1064_v33 = vmul.f32 %v1062_v10, %v1654_v8 }
 0x299   : > { %v1065_v49 = vadd.f32 %v1063_v32, %v1055_v22  ;;  %v1066_v34 = vadd.f32 %v1064_v33, %v1056_v31 }
 0x29b   : > { %v1074_v36 = vadd.f32 %v1071_v35, %v1066_v34  ;;  %v1073_v37 = vadd.f32 %v1071_v35, %v1065_v49 }
 0x29d   : > { %1079 = vrot.lane.b32.xlu2 %v1074_v36, %s1519_s18  ;;  %1077 = vrot.lane.b32.xlu1 %v1073_v37, %s1519_s18  ;;  %s1427_s18 = sshra.s32 %s1103_s17, 4  ;;  %s1428_s18 = int_to_ptr.hbm [resolvable:$true] %s1427_s18 }
 0x29e   : > { %s1429_s24 = scalar_lea.hbm %s1428_s18, 2  ;;  %p1434_p4 = scmp.lt.s32.totalorder %s1428_s18, %s1930_s6 }
 0x29f   : > { %p1430_p0 = scmp.ne.s32.totalorder %s1428_s18, %s1429_s24  ;;  %p1435_p5 = scmp.lt.s32.totalorder %s1433_s30, %s1429_s24 }
 0x2a1   : > { %p1431_p1 = pnand %p1430_p0, %p1606_p3  ;;  %p1436_p6 = por %p1435_p5, %p1434_p4 }
 0x2a3   : > { %p1432_p2 = pneg %p1431_p1 }
 0x2a5   : > { %p1437_p7 = pnand %p1436_p6, %p1432_p2 }
 0x2f7   : > { %v1080_v7 = vpop.permute.xlu2 %1079 }
 0x30f   : > { %v1078_v8 = vpop.permute.xlu1 %1077 }
 0x310   : > { %v1082_v23 = vsel %vm1081_vm0, %v1078_v8, %v1080_v7 }
 0x311   : > { %1084 = vst [vmem:[%s268_s13] sm:$0x3] %v1082_v23 }
 0x312   : > { %1440 = shalt.err (!%p1437_p7)
}
 0x313   : > { %1289 = dma.vmem_to_hbm [thread:$0]  (%p1606_p3), %s1101_s8, 32, %s1103_s17, %s1086_s25  }
 0x314 PF: > { %p1295_p9 = scmp.ge.s32.totalorder %s1507_s28, 2  ;;  %s1114_s20 = sand.u32 1, %s1479_s21  }
 0x315   : > { %s1115_s12 = scalar_lea.sflag [#allocation3], %s1114_s20 }
 0x316   : > { %p1292_p10 = pnand %p1295_p9, %p1615_p8 }
 0x318   : > { %p1293_p11 = pneg %p1292_p10 }
 0x31a   : > { %1474 = dma.done.wait (%p1293_p11), %s1115_s12, 32  }
 0x31b   : > { %1476 = vsyncadd (%p1293_p11), %s1115_s12, 4294967264  ;;  %s19_s28 = sadd.s32 1, %s1507_s28   ;;  %s1947_s10 = sld [smem:[#allocation5_spill]] }
 0x31c   : > { %p16_p12 = scmp.ge.s32.totalorder %s19_s28, 6   ;;  %s1948_s21 = smov %s1483_s22 }
 0x31d   : > { %s1949_s22 = smov %s1487_s23  ;;  %s1950_s23 = smov %s1624_s15 }
 0x31e   : > { %s1951_s24 = smov %s1499_s26  ;;  %s1952_s25 = smov %s1503_s27 }
 0x31f   : > { %s1953_s26 = smov %s1956_s7  ;;  %18 = sbr.rel (!%p16_p12) target bundleno = 5 (0x5), region = 88 }
 0x321   : > { %s1954_s27 = smov %s1947_s10 }
 0x324   :  { %1121 = vsyncpa [#allocation3], 1 }
 0x325   :  { %1123 = vsyncpa [#allocation3 + $0x1], 1 }

</bundles_post_ra>
